<compile_context>
chip_gen: v6e
topology: v6e:2x2x1
jax: 0.10.0
libtpu: 0.0.40
codegen_flags: <defaults>
</compile_context>

<pallas_src>
import functools
import math

import jax
import jax.numpy as jnp
from jax import lax
from jax.experimental import pallas as pl
from jax.experimental.pallas import tpu as pltpu


def _round_up(v: int, m: int) -> int:
    return ((v + m - 1) // m) * m


def _choose_token_tile(n_tokens: int, target: int) -> int:
    """Largest multiple-of-8 token tile <= target, aiming for >= 4 grid steps."""
    tm = min(_round_up(max(n_tokens, 1), 8), _round_up(max(target, 8), 8))
    if n_tokens >= 32:
        # >= 4 grid steps => 2 pipelined steps per v7x TensorCore.
        tm = min(tm, _round_up(pl.cdiv(n_tokens, 4), 8))
    return max(tm, 8)


def _divisor_tile(seq_len: int, cap: int):
    """Largest multiple-of-8 divisor of seq_len that is <= cap (or None)."""
    best = None
    d = 8
    while d <= min(seq_len, cap):
        if seq_len % d == 0:
            best = d
        d += 8
    return best


def _vmem_cap_bytes() -> int:
    try:
        return int(pltpu.get_tpu_info().vmem_capacity_bytes)
    except Exception:
        return 64 * 1024 * 1024  # conservative default (v7x per-core VMEM)


def prepare_gate_weight(weight):
    """Hoist the transpose/pad/cast of the (E, h) gate weight out of forward."""
    n_experts, h = weight.shape
    e_pad = _round_up(max(n_experts, 1), 128)
    wt = jnp.zeros((h, e_pad), jnp.float32)
    return wt.at[:, :n_experts].set(weight.astype(jnp.float32).T)


def _moe_gate_kernel(x_ref, wt_ref, *out_refs, n_experts: int, e_pad: int,
                     top_k: int, norm_topk_prob: bool, score_mode: str,
                     n_tokens: int):
    # x_ref:  (tm, h)     token tile, input dtype (bf16 OK)
    # wt_ref: (h, e_pad)  resident transposed gate weight, f32
    if score_mode == "full":
        scores_ref, tw_ref, ti_ref = out_refs
    elif score_mode == "sums":
        sums_ref, tw_ref, ti_ref = out_refs
    else:
        tw_ref, ti_ref = out_refs

    # f32 contraction (weight is f32, matching the torch gate); bf16
    # activations are upcast in VMEM so the HBM stream stays half-width.
    logits = jnp.dot(x_ref[...].astype(jnp.float32), wt_ref[...],
                     preferred_element_type=jnp.float32)        # (tm, e_pad)
    tm = logits.shape[0]

    col = lax.broadcasted_iota(jnp.int32, logits.shape, 1)
    neg_inf = jnp.float32(-jnp.inf)
    # Padded expert columns must never win.
    logits = jnp.where(col < n_experts, logits, neg_inf)

    # Softmax over experts in f32; exact reciprocal of the (tm, 1) denominator.
    m = jnp.max(logits, axis=-1, keepdims=True)
    e = jnp.exp(logits - m)                       # exp(-inf) = 0 on padded cols
    scores = e * (1.0 / jnp.sum(e, axis=-1, keepdims=True))

    if score_mode == "full":
        scores_ref[...] = scores
    elif score_mode == "sums":
        # Per-tile score sums over valid tokens only (padding rows masked).
        row = pl.program_id(0) * tm + lax.broadcasted_iota(jnp.int32,
                                                           logits.shape, 0)
        tile_sum = jnp.sum(jnp.where(row < n_tokens, scores, 0.0),
                           axis=0, keepdims=True)               # (1, e_pad)
        sums_ref[...] = jnp.broadcast_to(tile_sum, sums_ref.shape)

    # Top-k by iterative argmax.  Ties resolve to the lowest expert index
    # (matches jax.lax.top_k; torch.topk makes no stability guarantee).
    work = jnp.where(col < n_experts, scores, neg_inf)
    tw_cols, ti_cols = [], []
    for _ in range(top_k):
        mx = jnp.max(work, axis=-1, keepdims=True)              # (tm, 1)
        idx = jnp.min(jnp.where(work == mx, col, e_pad),
                      axis=-1, keepdims=True)                   # (tm, 1) i32
        tw_cols.append(mx)
        ti_cols.append(idx)
        work = jnp.where(col == idx, neg_inf, work)

    if top_k > 1 and norm_topk_prob:
        tw_sum = tw_cols[0]
        for t in tw_cols[1:]:
            tw_sum = tw_sum + t
        inv = 1.0 / (tw_sum + jnp.float32(1e-20))               # exact, (tm, 1)
        tw_cols = [t * inv for t in tw_cols]

    # Assemble the narrow (tm, top_k) outputs with lane selects (no concat).
    kcol = lax.broadcasted_iota(jnp.int32, (tm, top_k), 1)
    tw = jnp.zeros((tm, top_k), jnp.float32)
    ti = jnp.zeros((tm, top_k), jnp.int32)
    for j in range(top_k):
        tw = jnp.where(kcol == j, tw_cols[j], tw)
        ti = jnp.where(kcol == j, ti_cols[j], ti)
    tw_ref[...] = tw
    ti_ref[...] = ti


def moe_gate_forward(hidden_states, weight, *, prepared_wt=None, top_k=2,
                     norm_topk_prob=True, training=False, alpha=0.1,
                     seq_aux=True, block_tokens=512):
    """Returns (topk_idx, topk_weight, aux_loss), matching MoEGate.forward."""
    bsz, seq_len, h = hidden_states.shape
    n_experts = weight.shape[0]
    assert 1 <= top_k <= n_experts

    e_pad = _round_up(max(n_experts, 1), 128)
    x = hidden_states.reshape(-1, h)          # keep the input dtype (bf16 ok)
    n_tokens = x.shape[0]
    xb = x.dtype.itemsize

    cap = _vmem_cap_bytes()
    # Cap the tile so double-buffered x + its f32 upcast fit in ~1/3 of VMEM.
    bytes_per_row = h * (2 * xb + 4)
    row_budget = max((cap // 3) // max(bytes_per_row, 1), 8)
    tm_target = min(block_tokens, row_budget)

    emit_aux = bool(training) and alpha > 0.0
    tm_free = _choose_token_tile(n_tokens, tm_target)
    if emit_aux and seq_aux:
        tm_div = _divisor_tile(seq_len, max(tm_free, 8))
        if tm_div is not None:
            tm, score_mode = tm_div, "sums"       # tiles align with batches
        else:
            tm, score_mode = tm_free, "full"      # rare: seq_len % 8 != 0
    elif emit_aux:
        tm, score_mode = tm_free, "sums"
    else:
        tm, score_mode = tm_free, "none"

    grid_m = pl.cdiv(n_tokens, tm)
    n_pad = grid_m * tm
    if n_pad != n_tokens:
        x = jnp.pad(x, ((0, n_pad - n_tokens), (0, 0)))

    if prepared_wt is None:
        prepared_wt = prepare_gate_weight(weight)
    wt = prepared_wt
    assert wt.shape == (h, e_pad) and wt.dtype == jnp.float32

    out_shape, out_specs = [], []
    if score_mode == "full":
        out_shape.append(jax.ShapeDtypeStruct((n_pad, e_pad), jnp.float32))
        out_specs.append(pl.BlockSpec((tm, e_pad), lambda i: (i, 0)))
    elif score_mode == "sums":
        out_shape.append(jax.ShapeDtypeStruct((grid_m * 8, e_pad), jnp.float32))
        out_specs.append(pl.BlockSpec((8, e_pad), lambda i: (i, 0)))
    out_shape.append(jax.ShapeDtypeStruct((n_pad, top_k), jnp.float32))
    out_specs.append(pl.BlockSpec((tm, top_k), lambda i: (i, 0)))
    out_shape.append(jax.ShapeDtypeStruct((n_pad, top_k), jnp.int32))
    out_specs.append(pl.BlockSpec((tm, top_k), lambda i: (i, 0)))

    # Generation-aware VMEM budget: x tile double-buffered, weight resident,
    # small double-buffered outputs, plus in-kernel f32 temporaries; leave
    # ~24 MiB of the physical capacity for Mosaic internals (=> ~40 MiB cap
    # on v7x, ~104 MiB on v5e/v6e).
    score_tile = (tm * e_pad * 4 if score_mode == "full"
                  else 8 * e_pad * 4 if score_mode == "sums" else 0)
    vmem_est = (2 * tm * h * xb            # x tile (double-buffered)
                + h * e_pad * 4            # resident gate weight
                + 2 * 2 * tm * top_k * 4   # top-k weight + index tiles
                + 2 * score_tile
                + tm * h * 4               # f32 upcast of the x tile
                + 6 * tm * e_pad * 4)      # logits/exp/scores/work temporaries
    vmem_limit = int(min(max(cap // 2, cap - (24 << 20)),
                         vmem_est * 3 // 2 + (8 << 20)))

    kernel = functools.partial(
        _moe_gate_kernel, n_experts=n_experts, e_pad=e_pad, top_k=top_k,
        norm_topk_prob=norm_topk_prob, score_mode=score_mode,
        n_tokens=n_tokens)

    def run(single_buffer_weight):
        if single_buffer_weight:
            w_spec = pl.BlockSpec((h, e_pad), lambda i: (0, 0),
                                  pipeline_mode=pl.Buffered(1))
        else:
            w_spec = pl.BlockSpec((h, e_pad), lambda i: (0, 0))
        return pl.pallas_call(
            kernel,
            out_shape=tuple(out_shape),
            grid_spec=pltpu.PrefetchScalarGridSpec(
                num_scalar_prefetch=0,
                grid=(grid_m,),
                in_specs=[pl.BlockSpec((tm, h), lambda i: (i, 0)), w_spec],
                out_specs=tuple(out_specs)),
            compiler_params=pltpu.CompilerParams(
                dimension_semantics=("parallel",),
                vmem_limit_bytes=vmem_limit),
        )(x, wt)

    try:
        # The gate weight is grid-invariant: a single VMEM buffer suffices.
        outs = run(True)
    except Exception:
        outs = run(False)

    if score_mode == "full":
        full_scores, tw_out, ti_out = outs
    elif score_mode == "sums":
        sums_out, tw_out, ti_out = outs
    else:
        tw_out, ti_out = outs

    topk_weight = tw_out[:n_tokens]
    topk_idx = ti_out[:n_tokens]

    # Auxiliary load-balancing loss (plain-JAX glue; training only).
    if score_mode == "none":
        aux_loss = jnp.float32(0.0)
    else:
        idx_b = topk_idx.reshape(bsz, -1)
        ce_norm = seq_len * top_k / n_experts
        if score_mode == "sums":
            tile_sums = sums_out.reshape(grid_m, 8, e_pad)[:, 0, :n_experts]
            if seq_aux:
                tiles_per_batch = seq_len // tm
                mean_scores = (tile_sums.reshape(bsz, tiles_per_batch,
                                                 n_experts).sum(axis=1)
                               / seq_len)                         # (bsz, E)
                ce = jnp.sum(jax.nn.one_hot(idx_b, n_experts,
                                            dtype=jnp.float32), axis=1) / ce_norm
                aux_loss = jnp.mean(jnp.sum(ce * mean_scores, axis=1)) * alpha
            else:
                Pi = jnp.sum(tile_sums, axis=0) / n_tokens        # (E,)
                mask_ce = jax.nn.one_hot(idx_b.reshape(-1), n_experts,
                                         dtype=jnp.float32)
                ce = jnp.mean(mask_ce, axis=0)
                aux_loss = jnp.sum(Pi * ce * n_experts) * alpha
        else:  # "full" fallback
            scores = full_scores[:n_tokens, :n_experts]
            if seq_aux:
                scores_seq = scores.reshape(bsz, seq_len, n_experts)
                ce = jnp.sum(jax.nn.one_hot(idx_b, n_experts,
                                            dtype=jnp.float32), axis=1) / ce_norm
                aux_loss = jnp.mean(
                    jnp.sum(ce * jnp.mean(scores_seq, axis=1), axis=1)) * alpha
            else:
                mask_ce = jax.nn.one_hot(idx_b.reshape(-1), n_experts,
                                         dtype=jnp.float32)
                ce = jnp.mean(mask_ce, axis=0)
                Pi = jnp.mean(scores, axis=0)
                aux_loss = jnp.sum(Pi * ce * n_experts) * alpha

    return topk_idx, topk_weight, aux_loss


def moe_gate_reference(hidden_states, weight, *, top_k, norm_topk_prob=True):
    """Pure-JAX reference matching MoEGate.forward."""
    x = hidden_states.reshape(-1, hidden_states.shape[-1]).astype(jnp.float32)
    logits = jnp.dot(x, weight.astype(jnp.float32).T,
                     precision=lax.Precision.HIGHEST)
    scores = jax.nn.softmax(logits, axis=-1)
    tw, ti = lax.top_k(scores, top_k)
    if top_k > 1 and norm_topk_prob:
        tw = tw / (jnp.sum(tw, axis=-1, keepdims=True) + 1e-20)
    return ti, tw, scores


def reference_aux_loss(scores, topk_idx, *, bsz, seq_len, n_experts, top_k,
                       alpha, seq_aux):
    idx_b = topk_idx.reshape(bsz, -1)
    if seq_aux:
        scores_seq = scores.reshape(bsz, seq_len, n_experts)
        ce = jnp.sum(jax.nn.one_hot(idx_b, n_experts, dtype=jnp.float32),
                     axis=1) / (seq_len * top_k / n_experts)
        return jnp.mean(jnp.sum(ce * jnp.mean(scores_seq, axis=1),
                                axis=1)) * alpha
    mask_ce = jax.nn.one_hot(idx_b.reshape(-1), n_experts, dtype=jnp.float32)
    ce = jnp.mean(mask_ce, axis=0)
    Pi = jnp.mean(scores, axis=0)
    return jnp.sum(Pi * ce * n_experts) * alpha


def init_gate_weight(key, n_experts, hidden_size):
    # Matches nn.init.kaiming_uniform_(w, a=sqrt(5)) for a (E, h) matrix:
    # bound = sqrt(6 / ((1 + a^2) * fan_in)) = 1/sqrt(fan_in), fan_in = hidden.
    bound = 1.0 / math.sqrt(hidden_size)
    return jax.random.uniform(key, (n_experts, hidden_size),
                              dtype=jnp.float32, minval=-bound, maxval=bound)


if __name__ == "__main__":
    # Small config consistent with MiniMindConfig MoE defaults.
    bsz, seq_len, hidden = 2, 8, 32
    n_routed_experts, top_k = 4, 2
    alpha = 0.1

    key = jax.random.PRNGKey(0)
    k_w, k_x = jax.random.split(key)
    weight = init_gate_weight(k_w, n_routed_experts, hidden)
    hidden_states = jax.random.normal(k_x, (bsz, seq_len, hidden),
                                      dtype=jnp.float32)

    # Hoisted weight prep (done once per layer, not per forward call).
    wt_prepared = prepare_gate_weight(weight)

    # ---- Inference path (no scores output emitted) ----
    topk_idx, topk_weight, aux_loss = moe_gate_forward(
        hidden_states, weight, prepared_wt=wt_prepared,
        top_k=top_k, norm_topk_prob=True, training=False,
        alpha=alpha, seq_aux=True)
    jax.block_until_ready((topk_idx, topk_weight, aux_loss))
    assert topk_idx.shape == (bsz * seq_len, top_k)
    assert topk_weight.shape == (bsz * seq_len, top_k)
    assert float(aux_loss) == 0.0

    ref_idx, ref_w, ref_scores = moe_gate_reference(
        hidden_states, weight, top_k=top_k, norm_topk_prob=True)
    if not bool(jnp.array_equal(topk_idx, ref_idx)):
        # Tolerate flips only at numerical near-ties of the expert scores.
        sel_k = jnp.take_along_axis(ref_scores, topk_idx, axis=1)
        sel_r = jnp.take_along_axis(ref_scores, ref_idx, axis=1)
        assert bool(jnp.all(jnp.abs(sel_k - sel_r) < 5e-3)), \
            "top-k index mismatch"
    assert jnp.allclose(topk_weight, ref_w, atol=2e-3, rtol=2e-3), \
        "top-k weight mismatch"

    # ---- Training path (per-tile reduced scores + aux loss in glue) ----
    t_idx, t_w, t_aux = moe_gate_forward(
        hidden_states, weight, prepared_wt=wt_prepared,
        top_k=top_k, norm_topk_prob=True, training=True,
        alpha=alpha, seq_aux=True)
    jax.block_until_ready((t_idx, t_w, t_aux))
    ref_aux = reference_aux_loss(ref_scores, t_idx, bsz=bsz, seq_len=seq_len,
                                 n_experts=n_routed_experts, top_k=top_k,
                                 alpha=alpha, seq_aux=True)
    assert bool(jnp.isfinite(t_aux))
    assert jnp.allclose(t_aux, ref_aux, atol=2e-3, rtol=2e-2), \
        "aux loss mismatch"

    # ---- bf16 activations (halves the dominant HBM stream; weight stays f32) ----
    hs_bf16 = hidden_states.astype(jnp.bfloat16)
    b_idx, b_w, _ = moe_gate_forward(hs_bf16, weight, prepared_wt=wt_prepared,
                                     top_k=top_k, norm_topk_prob=True,
                                     training=False, alpha=alpha, seq_aux=True)
    jax.block_until_ready((b_idx, b_w))
    assert b_idx.shape == (bsz * seq_len, top_k)
    assert bool(jnp.all((b_idx >= 0) & (b_idx < n_routed_experts)))
    assert jnp.allclose(jnp.sum(b_w, axis=-1), 1.0, atol=1e-2)

    print("KERNEL_OK")
</pallas_src>

<mosaic_0001>
module attributes {stable_mosaic.version = 11 : i64} {
  func.func @_moe_gate_kernel(%arg0: i32, %arg1: memref<16x32xf32, #tpu.memory_space<vmem>>, %arg2: memref<32x128xf32, #tpu.memory_space<vmem>>, %arg3: memref<16x2xf32, #tpu.memory_space<vmem>>, %arg4: memref<16x2xi32, #tpu.memory_space<vmem>>) attributes {dimension_semantics = [#tpu.dimension_semantics<parallel>], iteration_bounds = array<i64: 1>, scalar_prefetch = 0 : i64, scratch_operands = 0 : i64, tpu.core_type = #tpu.core_type<tc>, window_params = [{transform_indices = @transform_0, window_bounds = array<i64: 16, 32>}, {pipeline_mode = #tpu.pipeline_mode<synchronous>, transform_indices = @transform_1, window_bounds = array<i64: 32, 128>}, {transform_indices = @transform_2, window_bounds = array<i64: 16, 2>}, {transform_indices = @transform_3, window_bounds = array<i64: 16, 2>}]} {
    %c0 = arith.constant 0 : index
    %c0_0 = arith.constant 0 : index
    %0 = vector.load %arg1[%c0, %c0_0] : memref<16x32xf32, #tpu.memory_space<vmem>>, vector<16x32xf32>
    %c0_1 = arith.constant 0 : index
    %c0_2 = arith.constant 0 : index
    %1 = vector.load %arg2[%c0_1, %c0_2] : memref<32x128xf32, #tpu.memory_space<vmem>>, vector<32x128xf32>
    %cst = arith.constant dense<0.000000e+00> : vector<16x128xf32>
    %2 = tpu.matmul %0, %1, %cst {dimension_numbers = #tpu.dot_dimension_numbers<[1], [0], [0], [1], [0, 0, 1, 1], [], []>} : vector<16x32xf32>, vector<32x128xf32>, vector<16x128xf32> -> vector<16x128xf32>
    %3 = tpu.iota {dimensions = array<i32: 1>} : vector<16x128xi32>
    %c4_i32 = arith.constant 4 : i32
    %4 = vector.broadcast %c4_i32 : i32 to vector<16x128xi32>
    %5 = arith.cmpi slt, %3, %4 : vector<16x128xi32>
    %cst_3 = arith.constant 0xFF800000 : f32
    %6 = vector.broadcast %cst_3 : f32 to vector<16x128xf32>
    %7 = arith.select %5, %2, %6 : vector<16x128xi1>, vector<16x128xf32>
    %cst_4 = arith.constant dense<0xFF800000> : vector<16xf32>
    %8 = vector.multi_reduction <maximumf>, %7, %cst_4 [1] : vector<16x128xf32> to vector<16xf32>
    %9 = vector.shape_cast %8 : vector<16xf32> to vector<16x1xf32>
    %10 = vector.broadcast %9 : vector<16x1xf32> to vector<16x128xf32>
    %11 = arith.subf %7, %10 : vector<16x128xf32>
    %12 = math.exp %11 : vector<16x128xf32>
    %cst_5 = arith.constant dense<0.000000e+00> : vector<16xf32>
    %13 = vector.multi_reduction <add>, %12, %cst_5 [1] : vector<16x128xf32> to vector<16xf32>
    %14 = vector.shape_cast %13 : vector<16xf32> to vector<16x1xf32>
    %cst_6 = arith.constant 1.000000e+00 : f32
    %15 = vector.broadcast %cst_6 : f32 to vector<16x1xf32>
    %16 = arith.divf %15, %14 : vector<16x1xf32>
    %17 = vector.broadcast %16 : vector<16x1xf32> to vector<16x128xf32>
    %18 = arith.mulf %12, %17 : vector<16x128xf32>
    %c4_i32_7 = arith.constant 4 : i32
    %19 = vector.broadcast %c4_i32_7 : i32 to vector<16x128xi32>
    %20 = arith.cmpi slt, %3, %19 : vector<16x128xi32>
    %cst_8 = arith.constant 0xFF800000 : f32
    %21 = vector.broadcast %cst_8 : f32 to vector<16x128xf32>
    %22 = arith.select %20, %18, %21 : vector<16x128xi1>, vector<16x128xf32>
    %cst_9 = arith.constant dense<0xFF800000> : vector<16xf32>
    %23 = vector.multi_reduction <maximumf>, %22, %cst_9 [1] : vector<16x128xf32> to vector<16xf32>
    %24 = vector.shape_cast %23 : vector<16xf32> to vector<16x1xf32>
    %25 = vector.broadcast %24 : vector<16x1xf32> to vector<16x128xf32>
    %26 = arith.cmpf oeq, %22, %25 : vector<16x128xf32>
    %c128_i32 = arith.constant 128 : i32
    %27 = vector.broadcast %c128_i32 : i32 to vector<16x128xi32>
    %28 = arith.select %26, %3, %27 : vector<16x128xi1>, vector<16x128xi32>
    %cst_10 = arith.constant dense<2147483647> : vector<16xi32>
    %29 = vector.multi_reduction <minsi>, %28, %cst_10 [1] : vector<16x128xi32> to vector<16xi32>
    %30 = vector.shape_cast %29 : vector<16xi32> to vector<16x1xi32>
    %31 = vector.broadcast %30 : vector<16x1xi32> to vector<16x128xi32>
    %32 = arith.cmpi eq, %3, %31 : vector<16x128xi32>
    %cst_11 = arith.constant 0xFF800000 : f32
    %33 = vector.broadcast %cst_11 : f32 to vector<16x128xf32>
    %34 = arith.select %32, %33, %22 : vector<16x128xi1>, vector<16x128xf32>
    %cst_12 = arith.constant dense<0xFF800000> : vector<16xf32>
    %35 = vector.multi_reduction <maximumf>, %34, %cst_12 [1] : vector<16x128xf32> to vector<16xf32>
    %36 = vector.shape_cast %35 : vector<16xf32> to vector<16x1xf32>
    %37 = vector.broadcast %36 : vector<16x1xf32> to vector<16x128xf32>
    %38 = arith.cmpf oeq, %34, %37 : vector<16x128xf32>
    %c128_i32_13 = arith.constant 128 : i32
    %39 = vector.broadcast %c128_i32_13 : i32 to vector<16x128xi32>
    %40 = arith.select %38, %3, %39 : vector<16x128xi1>, vector<16x128xi32>
    %cst_14 = arith.constant dense<2147483647> : vector<16xi32>
    %41 = vector.multi_reduction <minsi>, %40, %cst_14 [1] : vector<16x128xi32> to vector<16xi32>
    %42 = vector.shape_cast %41 : vector<16xi32> to vector<16x1xi32>
    %43 = arith.addf %24, %36 : vector<16x1xf32>
    %cst_15 = arith.constant 9.99999968E-21 : f32
    %44 = vector.broadcast %cst_15 : f32 to vector<16x1xf32>
    %45 = arith.addf %43, %44 : vector<16x1xf32>
    %cst_16 = arith.constant 1.000000e+00 : f32
    %46 = vector.broadcast %cst_16 : f32 to vector<16x1xf32>
    %47 = arith.divf %46, %45 : vector<16x1xf32>
    %48 = arith.mulf %24, %47 : vector<16x1xf32>
    %49 = arith.mulf %36, %47 : vector<16x1xf32>
    %50 = tpu.iota {dimensions = array<i32: 1>} : vector<16x2xi32>
    %cst_17 = arith.constant 0.000000e+00 : f32
    %51 = vector.broadcast %cst_17 : f32 to vector<16x2xf32>
    %c0_i32 = arith.constant 0 : i32
    %52 = vector.broadcast %c0_i32 : i32 to vector<16x2xi32>
    %c0_i32_18 = arith.constant 0 : i32
    %53 = vector.broadcast %c0_i32_18 : i32 to vector<16x2xi32>
    %54 = arith.cmpi eq, %50, %53 : vector<16x2xi32>
    %55 = vector.shape_cast %48 : vector<16x1xf32> to vector<16x1xf32>
    %56 = vector.broadcast %55 : vector<16x1xf32> to vector<16x2xf32>
    %57 = arith.select %54, %56, %51 : vector<16x2xi1>, vector<16x2xf32>
    %c0_i32_19 = arith.constant 0 : i32
    %58 = vector.broadcast %c0_i32_19 : i32 to vector<16x2xi32>
    %59 = arith.cmpi eq, %50, %58 : vector<16x2xi32>
    %60 = vector.shape_cast %30 : vector<16x1xi32> to vector<16x1xi32>
    %61 = vector.broadcast %60 : vector<16x1xi32> to vector<16x2xi32>
    %62 = arith.select %59, %61, %52 : vector<16x2xi1>, vector<16x2xi32>
    %c1_i32 = arith.constant 1 : i32
    %63 = vector.broadcast %c1_i32 : i32 to vector<16x2xi32>
    %64 = arith.cmpi eq, %50, %63 : vector<16x2xi32>
    %65 = vector.shape_cast %49 : vector<16x1xf32> to vector<16x1xf32>
    %66 = vector.broadcast %65 : vector<16x1xf32> to vector<16x2xf32>
    %67 = arith.select %64, %66, %57 : vector<16x2xi1>, vector<16x2xf32>
    %c1_i32_20 = arith.constant 1 : i32
    %68 = vector.broadcast %c1_i32_20 : i32 to vector<16x2xi32>
    %69 = arith.cmpi eq, %50, %68 : vector<16x2xi32>
    %70 = vector.shape_cast %42 : vector<16x1xi32> to vector<16x1xi32>
    %71 = vector.broadcast %70 : vector<16x1xi32> to vector<16x2xi32>
    %72 = arith.select %69, %71, %62 : vector<16x2xi1>, vector<16x2xi32>
    %c0_21 = arith.constant 0 : index
    %c0_22 = arith.constant 0 : index
    %73 = vector.load %arg3[%c0_21, %c0_22] : memref<16x2xf32, #tpu.memory_space<vmem>>, vector<16x2xf32>
    tpu.vector_store %arg3[%c0_21, %c0_22], %67 {strides = array<i32>} : memref<16x2xf32, #tpu.memory_space<vmem>>, vector<16x2xf32>,
    %c0_23 = arith.constant 0 : index
    %c0_24 = arith.constant 0 : index
    %74 = vector.load %arg4[%c0_23, %c0_24] : memref<16x2xi32, #tpu.memory_space<vmem>>, vector<16x2xi32>
    tpu.vector_store %arg4[%c0_23, %c0_24], %72 {strides = array<i32>} : memref<16x2xi32, #tpu.memory_space<vmem>>, vector<16x2xi32>,
    return
  }
  func.func @transform_0(%arg0: i32) -> (i32, i32) {
    %c0_i32 = arith.constant 0 : i32
    %c0_i32_0 = arith.constant 0 : i32
    return %arg0, %c0_i32 : i32, i32
  }
  func.func @transform_1(%arg0: i32) -> (i32, i32) {
    %c0_i32 = arith.constant 0 : i32
    %c0_i32_0 = arith.constant 0 : i32
    %c0_i32_1 = arith.constant 0 : i32
    return %c0_i32, %c0_i32_0 : i32, i32
  }
  func.func @transform_2(%arg0: i32) -> (i32, i32) {
    %c0_i32 = arith.constant 0 : i32
    %c0_i32_0 = arith.constant 0 : i32
    return %arg0, %c0_i32 : i32, i32
  }
  func.func @transform_3(%arg0: i32) -> (i32, i32) {
    %c0_i32 = arith.constant 0 : i32
    %c0_i32_0 = arith.constant 0 : i32
    return %arg0, %c0_i32 : i32, i32
  }
}

module attributes {stable_mosaic.version = 11 : i64} {
  func.func @_moe_gate_kernel(%arg0: i32, %arg1: memref<16x32xf32, #tpu.memory_space<vmem>>, %arg2: memref<32x128xf32, #tpu.memory_space<vmem>>, %arg3: memref<16x2xf32, #tpu.memory_space<vmem>>, %arg4: memref<16x2xi32, #tpu.memory_space<vmem>>) attributes {dimension_semantics = [#tpu.dimension_semantics<parallel>], iteration_bounds = array<i64: 1>, scalar_prefetch = 0 : i64, scratch_operands = 0 : i64, tpu.core_type = #tpu.core_type<tc>, window_params = [{transform_indices = @transform_0, window_bounds = array<i64: 16, 32>}, {pipeline_mode = #tpu.pipeline_mode<synchronous>, transform_indices = @transform_1, window_bounds = array<i64: 32, 128>}, {transform_indices = @transform_2, window_bounds = array<i64: 16, 2>}, {transform_indices = @transform_3, window_bounds = array<i64: 16, 2>}]} {
    %c0 = arith.constant 0 : index
    %c0_0 = arith.constant 0 : index
    %0 = vector.load %arg1[%c0, %c0_0] : memref<16x32xf32, #tpu.memory_space<vmem>>, vector<16x32xf32>
    %c0_1 = arith.constant 0 : index
    %c0_2 = arith.constant 0 : index
    %1 = vector.load %arg2[%c0_1, %c0_2] : memref<32x128xf32, #tpu.memory_space<vmem>>, vector<32x128xf32>
    %cst = arith.constant dense<0.000000e+00> : vector<16x128xf32>
    %2 = tpu.matmul %0, %1, %cst {dimension_numbers = #tpu.dot_dimension_numbers<[1], [0], [0], [1], [0, 0, 1, 1], [], []>} : vector<16x32xf32>, vector<32x128xf32>, vector<16x128xf32> -> vector<16x128xf32>
    %3 = tpu.iota {dimensions = array<i32: 1>} : vector<16x128xi32>
    %c4_i32 = arith.constant 4 : i32
    %4 = vector.broadcast %c4_i32 : i32 to vector<16x128xi32>
    %5 = arith.cmpi slt, %3, %4 : vector<16x128xi32>
    %cst_3 = arith.constant 0xFF800000 : f32
    %6 = vector.broadcast %cst_3 : f32 to vector<16x128xf32>
    %7 = arith.select %5, %2, %6 : vector<16x128xi1>, vector<16x128xf32>
    %cst_4 = arith.constant dense<0xFF800000> : vector<16xf32>
    %8 = vector.multi_reduction <maximumf>, %7, %cst_4 [1] : vector<16x128xf32> to vector<16xf32>
    %9 = vector.shape_cast %8 : vector<16xf32> to vector<16x1xf32>
    %10 = vector.broadcast %9 : vector<16x1xf32> to vector<16x128xf32>
    %11 = arith.subf %7, %10 : vector<16x128xf32>
    %12 = math.exp %11 : vector<16x128xf32>
    %cst_5 = arith.constant dense<0.000000e+00> : vector<16xf32>
    %13 = vector.multi_reduction <add>, %12, %cst_5 [1] : vector<16x128xf32> to vector<16xf32>
    %14 = vector.shape_cast %13 : vector<16xf32> to vector<16x1xf32>
    %cst_6 = arith.constant 1.000000e+00 : f32
    %15 = vector.broadcast %cst_6 : f32 to vector<16x1xf32>
    %16 = arith.divf %15, %14 : vector<16x1xf32>
    %17 = vector.broadcast %16 : vector<16x1xf32> to vector<16x128xf32>
    %18 = arith.mulf %12, %17 : vector<16x128xf32>
    %c4_i32_7 = arith.constant 4 : i32
    %19 = vector.broadcast %c4_i32_7 : i32 to vector<16x128xi32>
    %20 = arith.cmpi slt, %3, %19 : vector<16x128xi32>
    %cst_8 = arith.constant 0xFF800000 : f32
    %21 = vector.broadcast %cst_8 : f32 to vector<16x128xf32>
    %22 = arith.select %20, %18, %21 : vector<16x128xi1>, vector<16x128xf32>
    %cst_9 = arith.constant dense<0xFF800000> : vector<16xf32>
    %23 = vector.multi_reduction <maximumf>, %22, %cst_9 [1] : vector<16x128xf32> to vector<16xf32>
    %24 = vector.shape_cast %23 : vector<16xf32> to vector<16x1xf32>
    %25 = vector.broadcast %24 : vector<16x1xf32> to vector<16x128xf32>
    %26 = arith.cmpf oeq, %22, %25 : vector<16x128xf32>
    %c128_i32 = arith.constant 128 : i32
    %27 = vector.broadcast %c128_i32 : i32 to vector<16x128xi32>
    %28 = arith.select %26, %3, %27 : vector<16x128xi1>, vector<16x128xi32>
    %cst_10 = arith.constant dense<2147483647> : vector<16xi32>
    %29 = vector.multi_reduction <minsi>, %28, %cst_10 [1] : vector<16x128xi32> to vector<16xi32>
    %30 = vector.shape_cast %29 : vector<16xi32> to vector<16x1xi32>
    %31 = vector.broadcast %30 : vector<16x1xi32> to vector<16x128xi32>
    %32 = arith.cmpi eq, %3, %31 : vector<16x128xi32>
    %cst_11 = arith.constant 0xFF800000 : f32
    %33 = vector.broadcast %cst_11 : f32 to vector<16x128xf32>
    %34 = arith.select %32, %33, %22 : vector<16x128xi1>, vector<16x128xf32>
    %cst_12 = arith.constant dense<0xFF800000> : vector<16xf32>
    %35 = vector.multi_reduction <maximumf>, %34, %cst_12 [1] : vector<16x128xf32> to vector<16xf32>
    %36 = vector.shape_cast %35 : vector<16xf32> to vector<16x1xf32>
    %37 = vector.broadcast %36 : vector<16x1xf32> to vector<16x128xf32>
    %38 = arith.cmpf oeq, %34, %37 : vector<16x128xf32>
    %c128_i32_13 = arith.constant 128 : i32
    %39 = vector.broadcast %c128_i32_13 : i32 to vector<16x128xi32>
    %40 = arith.select %38, %3, %39 : vector<16x128xi1>, vector<16x128xi32>
    %cst_14 = arith.constant dense<2147483647> : vector<16xi32>
    %41 = vector.multi_reduction <minsi>, %40, %cst_14 [1] : vector<16x128xi32> to vector<16xi32>
    %42 = vector.shape_cast %41 : vector<16xi32> to vector<16x1xi32>
    %43 = arith.addf %24, %36 : vector<16x1xf32>
    %cst_15 = arith.constant 9.99999968E-21 : f32
    %44 = vector.broadcast %cst_15 : f32 to vector<16x1xf32>
    %45 = arith.addf %43, %44 : vector<16x1xf32>
    %cst_16 = arith.constant 1.000000e+00 : f32
    %46 = vector.broadcast %cst_16 : f32 to vector<16x1xf32>
    %47 = arith.divf %46, %45 : vector<16x1xf32>
    %48 = arith.mulf %24, %47 : vector<16x1xf32>
    %49 = arith.mulf %36, %47 : vector<16x1xf32>
    %50 = tpu.iota {dimensions = array<i32: 1>} : vector<16x2xi32>
    %cst_17 = arith.constant 0.000000e+00 : f32
    %51 = vector.broadcast %cst_17 : f32 to vector<16x2xf32>
    %c0_i32 = arith.constant 0 : i32
    %52 = vector.broadcast %c0_i32 : i32 to vector<16x2xi32>
    %c0_i32_18 = arith.constant 0 : i32
    %53 = vector.broadcast %c0_i32_18 : i32 to vector<16x2xi32>
    %54 = arith.cmpi eq, %50, %53 : vector<16x2xi32>
    %55 = vector.shape_cast %48 : vector<16x1xf32> to vector<16x1xf32>
    %56 = vector.broadcast %55 : vector<16x1xf32> to vector<16x2xf32>
    %57 = arith.select %54, %56, %51 : vector<16x2xi1>, vector<16x2xf32>
    %c0_i32_19 = arith.constant 0 : i32
    %58 = vector.broadcast %c0_i32_19 : i32 to vector<16x2xi32>
    %59 = arith.cmpi eq, %50, %58 : vector<16x2xi32>
    %60 = vector.shape_cast %30 : vector<16x1xi32> to vector<16x1xi32>
    %61 = vector.broadcast %60 : vector<16x1xi32> to vector<16x2xi32>
    %62 = arith.select %59, %61, %52 : vector<16x2xi1>, vector<16x2xi32>
    %c1_i32 = arith.constant 1 : i32
    %63 = vector.broadcast %c1_i32 : i32 to vector<16x2xi32>
    %64 = arith.cmpi eq, %50, %63 : vector<16x2xi32>
    %65 = vector.shape_cast %49 : vector<16x1xf32> to vector<16x1xf32>
    %66 = vector.broadcast %65 : vector<16x1xf32> to vector<16x2xf32>
    %67 = arith.select %64, %66, %57 : vector<16x2xi1>, vector<16x2xf32>
    %c1_i32_20 = arith.constant 1 : i32
    %68 = vector.broadcast %c1_i32_20 : i32 to vector<16x2xi32>
    %69 = arith.cmpi eq, %50, %68 : vector<16x2xi32>
    %70 = vector.shape_cast %42 : vector<16x1xi32> to vector<16x1xi32>
    %71 = vector.broadcast %70 : vector<16x1xi32> to vector<16x2xi32>
    %72 = arith.select %69, %71, %62 : vector<16x2xi1>, vector<16x2xi32>
    %c0_21 = arith.constant 0 : index
    %c0_22 = arith.constant 0 : index
    %73 = vector.load %arg3[%c0_21, %c0_22] : memref<16x2xf32, #tpu.memory_space<vmem>>, vector<16x2xf32>
    tpu.vector_store %arg3[%c0_21, %c0_22], %67 {strides = array<i32>} : memref<16x2xf32, #tpu.memory_space<vmem>>, vector<16x2xf32>,
    %c0_23 = arith.constant 0 : index
    %c0_24 = arith.constant 0 : index
    %74 = vector.load %arg4[%c0_23, %c0_24] : memref<16x2xi32, #tpu.memory_space<vmem>>, vector<16x2xi32>
    tpu.vector_store %arg4[%c0_23, %c0_24], %72 {strides = array<i32>} : memref<16x2xi32, #tpu.memory_space<vmem>>, vector<16x2xi32>,
    return
  }
  func.func @transform_0(%arg0: i32) -> (i32, i32) {
    %c0_i32 = arith.constant 0 : i32
    %c0_i32_0 = arith.constant 0 : i32
    return %arg0, %c0_i32 : i32, i32
  }
  func.func @transform_1(%arg0: i32) -> (i32, i32) {
    %c0_i32 = arith.constant 0 : i32
    %c0_i32_0 = arith.constant 0 : i32
    %c0_i32_1 = arith.constant 0 : i32
    return %c0_i32, %c0_i32_0 : i32, i32
  }
  func.func @transform_2(%arg0: i32) -> (i32, i32) {
    %c0_i32 = arith.constant 0 : i32
    %c0_i32_0 = arith.constant 0 : i32
    return %arg0, %c0_i32 : i32, i32
  }
  func.func @transform_3(%arg0: i32) -> (i32, i32) {
    %c0_i32 = arith.constant 0 : i32
    %c0_i32_0 = arith.constant 0 : i32
    return %arg0, %c0_i32 : i32, i32
  }
}

</mosaic_0001>

<bundles_post_ra>
// kernel: tpu_custom_call.1
= control target key start
LH: loop header
LB: loop body
LE: loop exit
PB: predicated region body
PF: predicated region fallthrough
CT: control target
= control target key end

     0   :  { %9 = vsyncpa [#allocation3], 0  ;;  %s440_s0 = inlined_call_operand.hbm [shape: f32[16,32], index: 0, kind: input, shape index: {}]   ;;  %s441_s1 = inlined_call_operand.hbm [shape: f32[32,128], index: 1, kind: input, shape index: {}]   ;;  %s442_s2 = inlined_call_operand.vmem [shape: f32[16,2], index: 2, kind: output, shape index: {0}]   ;;  %s443_s3 = inlined_call_operand.vmem [shape: s32[16,2], index: 3, kind: output, shape index: {1}]  }
   0x1   :  { %10 = vsyncpa [#allocation5], 0  ;;  %s348_s12 = smov [#allocation2]  }
   0x2   :  { %s16_s13 = sshll.u32 %s348_s12, 4  ;;  %s17_s13 = int_to_ptr.vmem [resolvable:$true] %s16_s13 }
   0x3   :  { %s312_s14 = scalar_lea.vmem %s17_s13, 256  ;;  %p317_p1 = scmp.lt.s32.totalorder %s17_s13, %s17_s13 }
   0x4   :  { %p313_p0 = scmp.ne.s32.totalorder %s17_s13, %s312_s14  ;;  %p318_p2 = scmp.lt.s32.totalorder %s312_s14, %s312_s14 }
   0x6   :  { %p319_p3 = por %p318_p2, %p317_p1 }
   0x8   :  { %p320_p4 = pnand %p319_p3, %p313_p0 }
   0xa   :  { %323 = shalt.err (!%p320_p4)
}
   0xb   :  { %s349_s15 = smov 128   ;;  %s350_s16 = smov 8  }
   0xc   :  { %22 = dma.hbm_to_vmem [thread:$0]  %s440_s0, 256, %s17_s13, [#allocation3], %s349_s15, %s349_s15, %s350_s16  }
   0xd   :  { %s351_s19 = smov [#allocation4]  }
   0xe   :  { %s28_s20 = sshll.u32 %s351_s19, 4  ;;  %s29_s20 = int_to_ptr.vmem [resolvable:$true] %s28_s20 }
   0xf   :  { %s332_s21 = scalar_lea.vmem %s29_s20, 512  ;;  %p337_p6 = scmp.lt.s32.totalorder %s29_s20, %s29_s20 }
  0x10   :  { %p333_p5 = scmp.ne.s32.totalorder %s29_s20, %s332_s21  ;;  %p338_p7 = scmp.lt.s32.totalorder %s332_s21, %s332_s21 }
  0x12   :  { %p339_p8 = por %p338_p7, %p337_p6 }
  0x14   :  { %p340_p9 = pnand %p339_p8, %p333_p5 }
  0x16   :  { %343 = shalt.err (!%p340_p9)
}
  0x17   :  { %34 = dma.hbm_to_vmem [thread:$0]  %s441_s1, 512, %s29_s20, [#allocation5], %s349_s15, %s349_s15, %s350_s16  }
  0x18   :  { %344 = dma.done.wait [#allocation3], 256  }
  0x19   :  { %345 = vsyncadd [#allocation3], 4294967040 }
  0x1a   :  { %346 = dma.done.wait [#allocation5], 512  }
  0x1b   :  { %347 = vsyncadd [#allocation5], 4294966784  ;;  %vm47_vm0 = vcmask 261120   ;;  %v46_v0 = vld [vmem:[#allocation4 + $0x18] sm:$0xff]  ;;  %v45_v1 = vld [vmem:[#allocation4 + $0x10] sm:$0xff]  ;;  %v129_v6 = vlaneseq  ;;  %vm254_vm12 = vcmask 15360  }
  0x1c   :  { %277 = vmatprep.subr.mxu0 %v46_v0  ;;  %v41_v2 = vld [vmem:[#allocation2] sm:$0xff]  ;;  %v44_v3 = vld [vmem:[#allocation4 + $0x8] sm:$0xff]  ;;  %v43_v4 = vld [vmem:[#allocation4] sm:$0xff] }
  0x1d   :  { %278 = vmatpush3.msra.mxu0 %v46_v0  ;;  %285 = vmatprep.mubr.msk.f32.mxu0 %vm47_vm0, %v41_v2  ;;  %v42_v5 = vld [vmem:[#allocation2 + $0x8] sm:$0xff]  ;;  %v380_v7 = vand.u32 127, %v129_v6 }
  0x1e   :  { %279 = vmatprep.subr.mxu0 %v45_v1 }
  0x1f   :  { %280 = vmatpush3.msra.mxu0 %v45_v1  ;;  %vm131_vm1 = vcmp.lt.s32.totalorder %v380_v7, 4  ;;  %vm249_vm10 = vcmp.eq.s32.totalorder %v380_v7, 1  ;;  %vm244_vm11 = vcmp.eq.s32.totalorder %v380_v7, 0 }
  0x20   :  { %281 = vmatprep.subr.mxu0 %v44_v3 }
  0x21   :  { %282 = vmatpush3.msra.mxu0 %v44_v3 }
  0x22   :  { %283 = vmatprep.subr.mxu0 %v43_v4 }
  0x23   :  { %284 = vmatpush3.msra.mxu0 %v43_v4 }
  0x24   :  { %286 = vmatmul.mubr.msk.f32.vlgmr.msra.gmra.mxu0 %vm47_vm0, %v42_v5 }
  0xe4   :  { %v287_v8 = vpop.f32.mrf.mxu0 }
  0xe5   :  { %v133_v11 = vsel %vm131_vm1, %v287_v8, -inf }
  0xe6   :  { %v120_v9 = vpop.f32.mrf.mxu0 }
  0xe7   :  { %v132_v10 = vsel %vm131_vm1, %v120_v9, -inf }
  0xe8   :  { %134 = vmax.xlane.f32.xlu0 %v132_v10 }
  0xec   :  { %136 = vmax.xlane.f32.xlu0 %v133_v11 }
 0x171   :  { %v135_v12 = vpop.xlane.xlu0 %134 }
 0x172   :  { %v138_v13 = vsub.f32 %v132_v10, %v135_v12 }
 0x174   :  { %v140_v14 = vmul.f32 1.442695, %v138_v13 }
 0x175   :  { %v137_v15 = vpop.xlane.xlu0 %136 }
 0x176   :  { %292 = vpow2.f32 %v140_v14  ;;  %v139_v16 = vsub.f32 %v133_v11, %v137_v15 }
 0x178   :  { %v142_v17 = vmul.f32 1.442695, %v139_v16 }
 0x17a   :  { %294 = vpow2.f32 %v142_v17 }
 0x183   :  { %v293_v18 = vpop.eup %292 }
 0x184   :  { %144 = vadd.xlane.f32.xlu1 %v293_v18 }
 0x187   :  { %v295_v19 = vpop.eup %294 }
 0x188   :  { %146 = vadd.xlane.f32.xlu1 %v295_v19 }
 0x20d   :  { %v145_v20 = vpop.xlane.xlu1 %144 }
 0x20e   :  { %296 = vrcp.f32 %v145_v20 }
 0x211   :  { %v147_v21 = vpop.xlane.xlu1 %146 }
 0x212   :  { %298 = vrcp.f32 %v147_v21 }
 0x21b   :  { %v297_v22 = vpop.eup %296 }
 0x21c   :  { %v152_v23 = vmul.f32 %v297_v22, %v293_v18 }
 0x21e   :  { %v154_v24 = vsel %vm131_vm1, %v152_v23, -inf }
 0x21f   :  { %v299_v25 = vpop.eup %298  ;;  %156 = vmax.xlane.f32.xlu0 %v154_v24 }
 0x220   :  { %v153_v26 = vmul.f32 %v299_v25, %v295_v19 }
 0x222   :  { %v155_v27 = vsel %vm131_vm1, %v153_v26, -inf }
 0x223   :  { %158 = vmax.xlane.f32.xlu1 %v155_v27 }
 0x2a8   :  { %v157_v28 = vpop.xlane.xlu0 %156 }
 0x2a9   :  { %vm160_vm2 = vcmp.eq.f32.partialorder %v154_v24, %v157_v28 }
 0x2aa   :  { %v162_v29 = vsel %vm160_vm2, %v380_v7, 128 }
 0x2ab   :  { %v165_v30 = vshra.s32 %v162_v29, 16  ;;  %v164_v36 = vand.u32 65535, %v162_v29 }
 0x2ac   :  { %v392_v31 = vpop.xlane.xlu1 %158 }
 0x2ad   :  { %vm161_vm3 = vcmp.eq.f32.partialorder %v155_v27, %v392_v31  ;;  %v167_v32 = vcvt.s32.f32 %v165_v30  ;;  %v166_v38 = vcvt.s32.f32 %v164_v36 }
 0x2ae   :  { %v163_v33 = vsel %vm161_vm3, %v380_v7, 128 }
 0x2af   :  { %168 = vmin.xlane.f32.xlu0 %v167_v32  ;;  %v179_v34 = vshra.s32 %v163_v33, 16  ;;  %v178_v39 = vand.u32 65535, %v163_v33 }
 0x2b1   :  { %v181_v35 = vcvt.s32.f32 %v179_v34  ;;  %v180_v42 = vcvt.s32.f32 %v178_v39 }
 0x2b3   :  { %182 = vmin.xlane.f32.xlu1 %v181_v35 }
 0x338   :  { %v169_v37 = vpop.xlane.xlu0 %168 }
 0x339   :  { %vm170_vm4 = vcmp.eq.f32.partialorder %v167_v32, %v169_v37  ;;  %v175_v44 = vcvt.f32.s32 %v169_v37 }
 0x33a   :  { %v171_v40 = vsel %vm170_vm4, %v166_v38, inf }
 0x33b   :  { %172 = vmin.xlane.f32.xlu0 %v171_v40  ;;  %v176_v46 = vshll.u32 %v175_v44, 16 }
 0x33c   :  { %v183_v41 = vpop.xlane.xlu1 %182 }
 0x33d   :  { %vm184_vm5 = vcmp.eq.f32.partialorder %v181_v35, %v183_v41  ;;  %v189_v47 = vcvt.f32.s32 %v183_v41 }
 0x33e   :  { %v185_v43 = vsel %vm184_vm5, %v180_v42, inf }
 0x33f   :  { %186 = vmin.xlane.f32.xlu1 %v185_v43  ;;  %v190_v51 = vshll.u32 %v189_v47, 16 }
 0x3c4   :  { %v173_v45 = vpop.xlane.xlu0 %172 }
 0x3c5   :  { %v174_v48 = vcvt.f32.s32 %v173_v45 }
 0x3c7   :  { %v177_v49 = vadd.s32 %v176_v46, %v174_v48 }
 0x3c8   :  { %v187_v50 = vpop.xlane.xlu1 %186 }
 0x3c9   :  { %v188_v52 = vcvt.f32.s32 %v187_v50  ;;  %vm192_vm6 = vcmp.eq.s32.totalorder %v380_v7, %v177_v49  ;;  %v247_v29 = vsel %vm244_vm11, %v177_v49, 0 }
 0x3ca   :  { %v194_v53 = vsel %vm192_vm6, -inf, %v154_v24 }
 0x3cb   :  { %v397_v54 = vadd.s32 %v190_v51, %v188_v52  ;;  %196 = vmax.xlane.f32.xlu0 %v194_v53 }
 0x3cd   :  { %vm193_vm7 = vcmp.eq.s32.totalorder %v380_v7, %v397_v54  ;;  %v248_v35 = vsel %vm244_vm11, %v397_v54, 0 }
 0x3ce   :  { %v195_v55 = vsel %vm193_vm7, -inf, %v155_v27 }
 0x3cf   :  { %198 = vmax.xlane.f32.xlu1 %v195_v55 }
 0x454   :  { %v197_v56 = vpop.xlane.xlu0 %196 }
 0x455   :  { %vm200_vm8 = vcmp.eq.f32.partialorder %v194_v53, %v197_v56  ;;  %v232_v57 = vadd.f32 %v197_v56, %v157_v28 }
 0x456   :  { %v202_v58 = vsel %vm200_vm8, %v380_v7, 128 }
 0x457   :  { %v234_v59 = vadd.f32 1e-20, %v232_v57  ;;  %v205_v60 = vshra.s32 %v202_v58, 16  ;;  %v204_v15 = vand.u32 65535, %v202_v58 }
 0x458   :  { %v199_v61 = vpop.xlane.xlu1 %198 }
 0x459   :  { %300 = vrcp.f32 %v234_v59  ;;  %vm201_vm9 = vcmp.eq.f32.partialorder %v195_v55, %v199_v61  ;;  %v233_v62 = vadd.f32 %v199_v61, %v392_v31  ;;  %v207_v63 = vcvt.s32.f32 %v205_v60 }
 0x45a   :  { %v203_v0 = vsel %vm201_vm9, %v380_v7, 128  ;;  %v206_v17 = vcvt.s32.f32 %v204_v15 }
 0x45b   :  { %v235_v1 = vadd.f32 1e-20, %v233_v62  ;;  %208 = vmin.xlane.f32.xlu0 %v207_v63  ;;  %v219_v2 = vshra.s32 %v203_v0, 16  ;;  %v218_v18 = vand.u32 65535, %v203_v0 }
 0x45d   :  { %302 = vrcp.f32 %v235_v1  ;;  %v221_v3 = vcvt.s32.f32 %v219_v2  ;;  %v220_v21 = vcvt.s32.f32 %v218_v18 }
 0x45f   :  { %222 = vmin.xlane.f32.xlu1 %v221_v3 }
 0x466   :  { %v301_v4 = vpop.eup %300 }
 0x467   :  { %v240_v5 = vmul.f32 %v301_v4, %v157_v28  ;;  %v242_v6 = vmul.f32 %v301_v4, %v197_v56 }
 0x469   :  { %v245_v8 = vsel %vm244_vm11, %v240_v5, 0.0 }
 0x46a   :  { %v303_v9 = vpop.eup %302  ;;  %v250_v10 = vsel %vm249_vm10, %v242_v6, %v245_v8 }
 0x46b   :  { %255 = vst.msk [vmem:[%s442_s2] sm:$0xff] %vm254_vm12, %v250_v10  ;;  %v241_v11 = vmul.f32 %v303_v9, %v392_v31  ;;  %v243_v12 = vmul.f32 %v303_v9, %v199_v61 }
 0x46d   :  { %v246_v13 = vsel %vm244_vm11, %v241_v11, 0.0 }
 0x46e   :  { %v251_v14 = vsel %vm249_vm10, %v243_v12, %v246_v13 }
 0x46f   :  { %256 = vst.msk [vmem:[%s442_s2 + $0x8] sm:$0xff] %vm254_vm12, %v251_v14 }
 0x4e4   :  { %v209_v16 = vpop.xlane.xlu0 %208 }
 0x4e5   :  { %vm210_vm13 = vcmp.eq.f32.partialorder %v207_v63, %v209_v16  ;;  %v215_v23 = vcvt.f32.s32 %v209_v16 }
 0x4e6   :  { %v211_v19 = vsel %vm210_vm13, %v206_v17, inf }
 0x4e7   :  { %212 = vmin.xlane.f32.xlu0 %v211_v19  ;;  %v216_v25 = vshll.u32 %v215_v23, 16 }
 0x4e8   :  { %v223_v20 = vpop.xlane.xlu1 %222 }
 0x4e9   :  { %vm224_vm14 = vcmp.eq.f32.partialorder %v221_v3, %v223_v20  ;;  %v229_v26 = vcvt.f32.s32 %v223_v20 }
 0x4ea   :  { %v225_v22 = vsel %vm224_vm14, %v220_v21, inf }
 0x4eb   :  { %226 = vmin.xlane.f32.xlu1 %v225_v22  ;;  %v230_v31 = vshll.u32 %v229_v26, 16 }
 0x570   :  { %v213_v24 = vpop.xlane.xlu0 %212 }
 0x571   :  { %v214_v27 = vcvt.f32.s32 %v213_v24 }
 0x573   :  { %v217_v28 = vadd.s32 %v216_v25, %v214_v27 }
 0x574   :  { %v227_v30 = vpop.xlane.xlu1 %226 }
 0x575   :  { %v252_v32 = vsel %vm249_vm10, %v217_v28, %v247_v29  ;;  %v228_v33 = vcvt.f32.s32 %v227_v30 }
 0x576   :  { %257 = vst.msk [vmem:[%s443_s3] sm:$0xff] %vm254_vm12, %v252_v32 }
 0x577   :  { %v231_v34 = vadd.s32 %v230_v31, %v228_v33 }
 0x579   :  { %v253_v36 = vsel %vm249_vm10, %v231_v34, %v248_v35 }
 0x57a   :  { %258 = vst.msk [vmem:[%s443_s3 + $0x8] sm:$0xff] %vm254_vm12, %v253_v36 }
 0x57b   :  { %267 = vsyncpa [#allocation3], 1 }
 0x57c   :  { %268 = vsyncpa [#allocation5], 1 }

// kernel: tpu_custom_call.1
= control target key start
LH: loop header
LB: loop body
LE: loop exit
PB: predicated region body
PF: predicated region fallthrough
CT: control target
= control target key end

     0   :  { %9 = vsyncpa [#allocation3], 0  ;;  %s440_s0 = inlined_call_operand.hbm [shape: f32[16,32], index: 0, kind: input, shape index: {}]   ;;  %s441_s1 = inlined_call_operand.hbm [shape: f32[32,128], index: 1, kind: input, shape index: {}]   ;;  %s442_s2 = inlined_call_operand.vmem [shape: f32[16,2], index: 2, kind: output, shape index: {0}]   ;;  %s443_s3 = inlined_call_operand.vmem [shape: s32[16,2], index: 3, kind: output, shape index: {1}]  }
   0x1   :  { %10 = vsyncpa [#allocation5], 0  ;;  %s348_s12 = smov [#allocation2]  }
   0x2   :  { %s16_s13 = sshll.u32 %s348_s12, 4  ;;  %s17_s13 = int_to_ptr.vmem [resolvable:$true] %s16_s13 }
   0x3   :  { %s312_s14 = scalar_lea.vmem %s17_s13, 256  ;;  %p317_p1 = scmp.lt.s32.totalorder %s17_s13, %s17_s13 }
   0x4   :  { %p313_p0 = scmp.ne.s32.totalorder %s17_s13, %s312_s14  ;;  %p318_p2 = scmp.lt.s32.totalorder %s312_s14, %s312_s14 }
   0x6   :  { %p319_p3 = por %p318_p2, %p317_p1 }
   0x8   :  { %p320_p4 = pnand %p319_p3, %p313_p0 }
   0xa   :  { %323 = shalt.err (!%p320_p4)
}
   0xb   :  { %s349_s15 = smov 128   ;;  %s350_s16 = smov 8  }
   0xc   :  { %22 = dma.hbm_to_vmem [thread:$0]  %s440_s0, 256, %s17_s13, [#allocation3], %s349_s15, %s349_s15, %s350_s16  }
   0xd   :  { %s351_s19 = smov [#allocation4]  }
   0xe   :  { %s28_s20 = sshll.u32 %s351_s19, 4  ;;  %s29_s20 = int_to_ptr.vmem [resolvable:$true] %s28_s20 }
   0xf   :  { %s332_s21 = scalar_lea.vmem %s29_s20, 512  ;;  %p337_p6 = scmp.lt.s32.totalorder %s29_s20, %s29_s20 }
  0x10   :  { %p333_p5 = scmp.ne.s32.totalorder %s29_s20, %s332_s21  ;;  %p338_p7 = scmp.lt.s32.totalorder %s332_s21, %s332_s21 }
  0x12   :  { %p339_p8 = por %p338_p7, %p337_p6 }
  0x14   :  { %p340_p9 = pnand %p339_p8, %p333_p5 }
  0x16   :  { %343 = shalt.err (!%p340_p9)
}
  0x17   :  { %34 = dma.hbm_to_vmem [thread:$0]  %s441_s1, 512, %s29_s20, [#allocation5], %s349_s15, %s349_s15, %s350_s16  }
  0x18   :  { %344 = dma.done.wait [#allocation3], 256  }
  0x19   :  { %345 = vsyncadd [#allocation3], 4294967040 }
  0x1a   :  { %346 = dma.done.wait [#allocation5], 512  }
  0x1b   :  { %347 = vsyncadd [#allocation5], 4294966784  ;;  %vm47_vm0 = vcmask 261120   ;;  %v46_v0 = vld [vmem:[#allocation4 + $0x18] sm:$0xff]  ;;  %v45_v1 = vld [vmem:[#allocation4 + $0x10] sm:$0xff]  ;;  %v129_v6 = vlaneseq  ;;  %vm254_vm12 = vcmask 15360  }
  0x1c   :  { %277 = vmatprep.subr.mxu0 %v46_v0  ;;  %v41_v2 = vld [vmem:[#allocation2] sm:$0xff]  ;;  %v44_v3 = vld [vmem:[#allocation4 + $0x8] sm:$0xff]  ;;  %v43_v4 = vld [vmem:[#allocation4] sm:$0xff] }
  0x1d   :  { %278 = vmatpush3.msra.mxu0 %v46_v0  ;;  %285 = vmatprep.mubr.msk.f32.mxu0 %vm47_vm0, %v41_v2  ;;  %v42_v5 = vld [vmem:[#allocation2 + $0x8] sm:$0xff]  ;;  %v380_v7 = vand.u32 127, %v129_v6 }
  0x1e   :  { %279 = vmatprep.subr.mxu0 %v45_v1 }
  0x1f   :  { %280 = vmatpush3.msra.mxu0 %v45_v1  ;;  %vm131_vm1 = vcmp.lt.s32.totalorder %v380_v7, 4  ;;  %vm249_vm10 = vcmp.eq.s32.totalorder %v380_v7, 1  ;;  %vm244_vm11 = vcmp.eq.s32.totalorder %v380_v7, 0 }
  0x20   :  { %281 = vmatprep.subr.mxu0 %v44_v3 }
  0x21   :  { %282 = vmatpush3.msra.mxu0 %v44_v3 }
  0x22   :  { %283 = vmatprep.subr.mxu0 %v43_v4 }
  0x23   :  { %284 = vmatpush3.msra.mxu0 %v43_v4 }
  0x24   :  { %286 = vmatmul.mubr.msk.f32.vlgmr.msra.gmra.mxu0 %vm47_vm0, %v42_v5 }
  0xe4   :  { %v287_v8 = vpop.f32.mrf.mxu0 }
  0xe5   :  { %v133_v11 = vsel %vm131_vm1, %v287_v8, -inf }
  0xe6   :  { %v120_v9 = vpop.f32.mrf.mxu0 }
  0xe7   :  { %v132_v10 = vsel %vm131_vm1, %v120_v9, -inf }
  0xe8   :  { %134 = vmax.xlane.f32.xlu0 %v132_v10 }
  0xec   :  { %136 = vmax.xlane.f32.xlu0 %v133_v11 }
 0x171   :  { %v135_v12 = vpop.xlane.xlu0 %134 }
 0x172   :  { %v138_v13 = vsub.f32 %v132_v10, %v135_v12 }
 0x174   :  { %v140_v14 = vmul.f32 1.442695, %v138_v13 }
 0x175   :  { %v137_v15 = vpop.xlane.xlu0 %136 }
 0x176   :  { %292 = vpow2.f32 %v140_v14  ;;  %v139_v16 = vsub.f32 %v133_v11, %v137_v15 }
 0x178   :  { %v142_v17 = vmul.f32 1.442695, %v139_v16 }
 0x17a   :  { %294 = vpow2.f32 %v142_v17 }
 0x183   :  { %v293_v18 = vpop.eup %292 }
 0x184   :  { %144 = vadd.xlane.f32.xlu1 %v293_v18 }
 0x187   :  { %v295_v19 = vpop.eup %294 }
 0x188   :  { %146 = vadd.xlane.f32.xlu1 %v295_v19 }
 0x20d   :  { %v145_v20 = vpop.xlane.xlu1 %144 }
 0x20e   :  { %296 = vrcp.f32 %v145_v20 }
 0x211   :  { %v147_v21 = vpop.xlane.xlu1 %146 }
 0x212   :  { %298 = vrcp.f32 %v147_v21 }
 0x21b   :  { %v297_v22 = vpop.eup %296 }
 0x21c   :  { %v152_v23 = vmul.f32 %v297_v22, %v293_v18 }
 0x21e   :  { %v154_v24 = vsel %vm131_vm1, %v152_v23, -inf }
 0x21f   :  { %v299_v25 = vpop.eup %298  ;;  %156 = vmax.xlane.f32.xlu0 %v154_v24 }
 0x220   :  { %v153_v26 = vmul.f32 %v299_v25, %v295_v19 }
 0x222   :  { %v155_v27 = vsel %vm131_vm1, %v153_v26, -inf }
 0x223   :  { %158 = vmax.xlane.f32.xlu1 %v155_v27 }
 0x2a8   :  { %v157_v28 = vpop.xlane.xlu0 %156 }
 0x2a9   :  { %vm160_vm2 = vcmp.eq.f32.partialorder %v154_v24, %v157_v28 }
 0x2aa   :  { %v162_v29 = vsel %vm160_vm2, %v380_v7, 128 }
 0x2ab   :  { %v165_v30 = vshra.s32 %v162_v29, 16  ;;  %v164_v36 = vand.u32 65535, %v162_v29 }
 0x2ac   :  { %v392_v31 = vpop.xlane.xlu1 %158 }
 0x2ad   :  { %vm161_vm3 = vcmp.eq.f32.partialorder %v155_v27, %v392_v31  ;;  %v167_v32 = vcvt.s32.f32 %v165_v30  ;;  %v166_v38 = vcvt.s32.f32 %v164_v36 }
 0x2ae   :  { %v163_v33 = vsel %vm161_vm3, %v380_v7, 128 }
 0x2af   :  { %168 = vmin.xlane.f32.xlu0 %v167_v32  ;;  %v179_v34 = vshra.s32 %v163_v33, 16  ;;  %v178_v39 = vand.u32 65535, %v163_v33 }
 0x2b1   :  { %v181_v35 = vcvt.s32.f32 %v179_v34  ;;  %v180_v42 = vcvt.s32.f32 %v178_v39 }
 0x2b3   :  { %182 = vmin.xlane.f32.xlu1 %v181_v35 }
 0x338   :  { %v169_v37 = vpop.xlane.xlu0 %168 }
 0x339   :  { %vm170_vm4 = vcmp.eq.f32.partialorder %v167_v32, %v169_v37  ;;  %v175_v44 = vcvt.f32.s32 %v169_v37 }
 0x33a   :  { %v171_v40 = vsel %vm170_vm4, %v166_v38, inf }
 0x33b   :  { %172 = vmin.xlane.f32.xlu0 %v171_v40  ;;  %v176_v46 = vshll.u32 %v175_v44, 16 }
 0x33c   :  { %v183_v41 = vpop.xlane.xlu1 %182 }
 0x33d   :  { %vm184_vm5 = vcmp.eq.f32.partialorder %v181_v35, %v183_v41  ;;  %v189_v47 = vcvt.f32.s32 %v183_v41 }
 0x33e   :  { %v185_v43 = vsel %vm184_vm5, %v180_v42, inf }
 0x33f   :  { %186 = vmin.xlane.f32.xlu1 %v185_v43  ;;  %v190_v51 = vshll.u32 %v189_v47, 16 }
 0x3c4   :  { %v173_v45 = vpop.xlane.xlu0 %172 }
 0x3c5   :  { %v174_v48 = vcvt.f32.s32 %v173_v45 }
 0x3c7   :  { %v177_v49 = vadd.s32 %v176_v46, %v174_v48 }
 0x3c8   :  { %v187_v50 = vpop.xlane.xlu1 %186 }
 0x3c9   :  { %v188_v52 = vcvt.f32.s32 %v187_v50  ;;  %vm192_vm6 = vcmp.eq.s32.totalorder %v380_v7, %v177_v49  ;;  %v247_v29 = vsel %vm244_vm11, %v177_v49, 0 }
 0x3ca   :  { %v194_v53 = vsel %vm192_vm6, -inf, %v154_v24 }
 0x3cb   :  { %v397_v54 = vadd.s32 %v190_v51, %v188_v52  ;;  %196 = vmax.xlane.f32.xlu0 %v194_v53 }
 0x3cd   :  { %vm193_vm7 = vcmp.eq.s32.totalorder %v380_v7, %v397_v54  ;;  %v248_v35 = vsel %vm244_vm11, %v397_v54, 0 }
 0x3ce   :  { %v195_v55 = vsel %vm193_vm7, -inf, %v155_v27 }
 0x3cf   :  { %198 = vmax.xlane.f32.xlu1 %v195_v55 }
 0x454   :  { %v197_v56 = vpop.xlane.xlu0 %196 }
 0x455   :  { %vm200_vm8 = vcmp.eq.f32.partialorder %v194_v53, %v197_v56  ;;  %v232_v57 = vadd.f32 %v197_v56, %v157_v28 }
 0x456   :  { %v202_v58 = vsel %vm200_vm8, %v380_v7, 128 }
 0x457   :  { %v234_v59 = vadd.f32 1e-20, %v232_v57  ;;  %v205_v60 = vshra.s32 %v202_v58, 16  ;;  %v204_v15 = vand.u32 65535, %v202_v58 }
 0x458   :  { %v199_v61 = vpop.xlane.xlu1 %198 }
 0x459   :  { %300 = vrcp.f32 %v234_v59  ;;  %vm201_vm9 = vcmp.eq.f32.partialorder %v195_v55, %v199_v61  ;;  %v233_v62 = vadd.f32 %v199_v61, %v392_v31  ;;  %v207_v63 = vcvt.s32.f32 %v205_v60 }
 0x45a   :  { %v203_v0 = vsel %vm201_vm9, %v380_v7, 128  ;;  %v206_v17 = vcvt.s32.f32 %v204_v15 }
 0x45b   :  { %v235_v1 = vadd.f32 1e-20, %v233_v62  ;;  %208 = vmin.xlane.f32.xlu0 %v207_v63  ;;  %v219_v2 = vshra.s32 %v203_v0, 16  ;;  %v218_v18 = vand.u32 65535, %v203_v0 }
 0x45d   :  { %302 = vrcp.f32 %v235_v1  ;;  %v221_v3 = vcvt.s32.f32 %v219_v2  ;;  %v220_v21 = vcvt.s32.f32 %v218_v18 }
 0x45f   :  { %222 = vmin.xlane.f32.xlu1 %v221_v3 }
 0x466   :  { %v301_v4 = vpop.eup %300 }
 0x467   :  { %v240_v5 = vmul.f32 %v301_v4, %v157_v28  ;;  %v242_v6 = vmul.f32 %v301_v4, %v197_v56 }
 0x469   :  { %v245_v8 = vsel %vm244_vm11, %v240_v5, 0.0 }
 0x46a   :  { %v303_v9 = vpop.eup %302  ;;  %v250_v10 = vsel %vm249_vm10, %v242_v6, %v245_v8 }
 0x46b   :  { %255 = vst.msk [vmem:[%s442_s2] sm:$0xff] %vm254_vm12, %v250_v10  ;;  %v241_v11 = vmul.f32 %v303_v9, %v392_v31  ;;  %v243_v12 = vmul.f32 %v303_v9, %v199_v61 }
 0x46d   :  { %v246_v13 = vsel %vm244_vm11, %v241_v11, 0.0 }
 0x46e   :  { %v251_v14 = vsel %vm249_vm10, %v243_v12, %v246_v13 }
 0x46f   :  { %256 = vst.msk [vmem:[%s442_s2 + $0x8] sm:$0xff] %vm254_vm12, %v251_v14 }
 0x4e4   :  { %v209_v16 = vpop.xlane.xlu0 %208 }
 0x4e5   :  { %vm210_vm13 = vcmp.eq.f32.partialorder %v207_v63, %v209_v16  ;;  %v215_v23 = vcvt.f32.s32 %v209_v16 }
 0x4e6   :  { %v211_v19 = vsel %vm210_vm13, %v206_v17, inf }
 0x4e7   :  { %212 = vmin.xlane.f32.xlu0 %v211_v19  ;;  %v216_v25 = vshll.u32 %v215_v23, 16 }
 0x4e8   :  { %v223_v20 = vpop.xlane.xlu1 %222 }
 0x4e9   :  { %vm224_vm14 = vcmp.eq.f32.partialorder %v221_v3, %v223_v20  ;;  %v229_v26 = vcvt.f32.s32 %v223_v20 }
 0x4ea   :  { %v225_v22 = vsel %vm224_vm14, %v220_v21, inf }
 0x4eb   :  { %226 = vmin.xlane.f32.xlu1 %v225_v22  ;;  %v230_v31 = vshll.u32 %v229_v26, 16 }
 0x570   :  { %v213_v24 = vpop.xlane.xlu0 %212 }
 0x571   :  { %v214_v27 = vcvt.f32.s32 %v213_v24 }
 0x573   :  { %v217_v28 = vadd.s32 %v216_v25, %v214_v27 }
 0x574   :  { %v227_v30 = vpop.xlane.xlu1 %226 }
 0x575   :  { %v252_v32 = vsel %vm249_vm10, %v217_v28, %v247_v29  ;;  %v228_v33 = vcvt.f32.s32 %v227_v30 }
 0x576   :  { %257 = vst.msk [vmem:[%s443_s3] sm:$0xff] %vm254_vm12, %v252_v32 }
 0x577   :  { %v231_v34 = vadd.s32 %v230_v31, %v228_v33 }
 0x579   :  { %v253_v36 = vsel %vm249_vm10, %v231_v34, %v248_v35 }
 0x57a   :  { %258 = vst.msk [vmem:[%s443_s3 + $0x8] sm:$0xff] %vm254_vm12, %v253_v36 }
 0x57b   :  { %267 = vsyncpa [#allocation3], 1 }
 0x57c   :  { %268 = vsyncpa [#allocation5], 1 }

</bundles_post_ra>
